<compile_context>
chip_gen: v5e
topology: v5e:2x2
jax: 0.10.0
libtpu: 0.0.40
codegen_flags: <defaults>
</compile_context>

<pallas_src>
import jax
import jax.numpy as jnp
from jax.experimental import pallas as pl
from jax.experimental.pallas import tpu as pltpu

WINDOW = 5  # fixed context window of the NER model


def _round_up(x, m):
    return (x + m - 1) // m * m


def ner_logits_kernel(act_ref, w_ref, b_ref, out_ref):
    # act_ref: (tile, 5E) bf16   w_ref: (Cpad, 5E) bf16
    # b_ref  : (Cpad, 1)  f32    out_ref: (Cpad, tile) f32
    logits = jax.lax.dot_general(
        w_ref[...], act_ref[...],
        dimension_numbers=(((1,), (1,)), ((), ())),   # contract the shared 5E axis
        preferred_element_type=jnp.float32,
    )                                                  # (Cpad, tile) f32
    out_ref[...] = (logits + b_ref[...]).astype(out_ref.dtype)


def _choose_tile(n_pad, tile_n):
    if n_pad <= 256:
        return n_pad  # single block spanning the whole (padded) batch
    # Keep at least 2 grid steps (v7x has 2 TensorCores).  Lane-dim output blocks
    # must be 128-multiples unless they span the full array.
    half = _round_up(pl.cdiv(n_pad, 2), 128)
    return min(_round_up(tile_n, 128), half)


def ner_forward(x, emb, weight, bias, *, tile_n=1024):
    """Pallas equivalent of NERModel.forward.

    x      : (N, 5)   integer token ids
    emb    : (V, E)   embedding table
    weight : (C, 5*E) linear weight (PyTorch convention, y = a @ W^T + b)
    bias   : (C,)     linear bias
    returns: (N, C)   float32 logits
    """
    n = x.shape[0]
    _, e = emb.shape
    c = weight.shape[0]
    k = WINDOW * e

    # ---- embedding lookup (XLA gather) in bf16; pad only the cheap ids array ----
    n_pad = _round_up(n, 8)
    ids = x.astype(jnp.int32)
    if n_pad != n:
        ids = jnp.pad(ids, ((0, n_pad - n), (0, 0)))
    act = jnp.take(emb.astype(jnp.bfloat16), ids.reshape(-1), axis=0)
    act = act.reshape(n_pad, k)                                     # (Npad, 5E) bf16

    # ---- narrow padded class dim (C -> multiple of 8 sublanes), bf16 weights ----
    c_pad = _round_up(c, 8)
    w_p = jnp.pad(weight.astype(jnp.bfloat16), ((0, c_pad - c), (0, 0)))  # (Cpad, 5E)
    b_p = jnp.pad(bias.astype(jnp.float32), (0, c_pad - c)).reshape(c_pad, 1)

    tile = _choose_tile(n_pad, tile_n)
    grid = (pl.cdiv(n_pad, tile),)

    bytes_accessed = act.size * 2 + w_p.size * 2 + b_p.size * 4 + c_pad * n_pad * 4
    out = pl.pallas_call(
        ner_logits_kernel,
        out_shape=jax.ShapeDtypeStruct((c_pad, n_pad), jnp.float32),
        grid=grid,
        in_specs=[
            pl.BlockSpec((tile, k), lambda i: (i, 0)),     # activations: tiled over N
            pl.BlockSpec((c_pad, k), lambda i: (0, 0)),    # weight: VMEM-resident
            pl.BlockSpec((c_pad, 1), lambda i: (0, 0)),    # bias: VMEM-resident
        ],
        out_specs=pl.BlockSpec((c_pad, tile), lambda i: (0, i)),    # N on lanes
        compiler_params=pltpu.CompilerParams(
            dimension_semantics=("parallel",),
            allow_input_fusion=[True, True, True],
        ),
        cost_estimate=pl.CostEstimate(
            flops=2 * n_pad * k * c_pad,
            transcendentals=0,
            bytes_accessed=bytes_accessed,
        ),
    )(act, w_p, b_p)

    return out[:c, :n].T                                            # (N, C) f32


if __name__ == "__main__":
    vocab_size = 100
    emb_size = 32        # 5 * 32 = 160 contraction dim (kept un-padded on purpose)
    n_class = 9          # not a multiple of 8  -> exercises class padding
    batch = 10           # not a multiple of 8  -> exercises row padding

    key = jax.random.PRNGKey(0)
    k_idx, k_emb, k_w, k_b, k_idx2 = jax.random.split(key, 5)

    fan_in = emb_size * WINDOW
    bound = 1.0 / (fan_in ** 0.5)
    x = jax.random.randint(k_idx, (batch, WINDOW), 0, vocab_size, dtype=jnp.int32)
    emb_table = jax.random.normal(k_emb, (vocab_size, emb_size), dtype=jnp.float32)
    weight = jax.random.uniform(k_w, (n_class, fan_in), jnp.float32, -bound, bound)
    bias = jax.random.uniform(k_b, (n_class,), jnp.float32, -bound, bound)

    def reference(ids, emb_f32, w_f32, b_f32):
        a = jnp.take(emb_f32, ids.reshape(-1), axis=0).reshape(ids.shape[0], -1)
        return jnp.dot(a, w_f32.T, precision=jax.lax.Precision.HIGHEST) + b_f32

    # Kernel computes with bf16 inputs + f32 accumulation -> compare tightly against
    # a bf16-rounded f32 reference, and loosely against the pure-f32 reference.
    emb_r = emb_table.astype(jnp.bfloat16).astype(jnp.float32)
    w_r = weight.astype(jnp.bfloat16).astype(jnp.float32)

    # --- single-block case (N=10, grid=(1,)) ---
    out = jax.block_until_ready(ner_forward(x, emb_table, weight, bias))
    assert out.shape == (batch, n_class) and out.dtype == jnp.float32
    assert jnp.allclose(out, reference(x, emb_r, w_r, bias), atol=2e-3, rtol=2e-3)
    assert jnp.allclose(out, reference(x, emb_table, weight, bias), atol=3e-2, rtol=3e-2)

    # --- multi-step parallel grid with a ragged last block (N=272 -> grid=(2,)) ---
    n2 = 272
    x2 = jax.random.randint(k_idx2, (n2, WINDOW), 0, vocab_size, dtype=jnp.int32)
    out2 = jax.block_until_ready(ner_forward(x2, emb_table, weight, bias))
    assert out2.shape == (n2, n_class)
    assert jnp.allclose(out2, reference(x2, emb_r, w_r, bias), atol=2e-3, rtol=2e-3)

    # --- smaller tiles -> longer grid (tile=128, grid=(3,)) must match ---
    out3 = jax.block_until_ready(ner_forward(x2, emb_table, weight, bias, tile_n=128))
    assert jnp.allclose(out3, out2, atol=1e-5, rtol=1e-5)

    print("KERNEL_OK")
</pallas_src>

<mosaic_0001>
module attributes {stable_mosaic.version = 11 : i64} {
  func.func @ner_logits_kernel(%arg0: i32, %arg1: memref<16x160xbf16, #tpu.memory_space<vmem>>, %arg2: memref<16x160xbf16, #tpu.memory_space<vmem>>, %arg3: memref<16x1xf32, #tpu.memory_space<vmem>>, %arg4: memref<16x16xf32, #tpu.memory_space<vmem>>) attributes {dimension_semantics = [#tpu.dimension_semantics<parallel>], iteration_bounds = array<i64: 1>, scalar_prefetch = 0 : i64, scratch_operands = 0 : i64, tpu.core_type = #tpu.core_type<tc>, window_params = [{transform_indices = @transform_0, window_bounds = array<i64: 16, 160>}, {pipeline_mode = #tpu.pipeline_mode<synchronous>, transform_indices = @transform_1, window_bounds = array<i64: 16, 160>}, {pipeline_mode = #tpu.pipeline_mode<synchronous>, transform_indices = @transform_2, window_bounds = array<i64: 16, 1>}, {transform_indices = @transform_3, window_bounds = array<i64: 16, 16>}]} {
    %c0 = arith.constant 0 : index
    %c0_0 = arith.constant 0 : index
    %0 = vector.load %arg2[%c0, %c0_0] : memref<16x160xbf16, #tpu.memory_space<vmem>>, vector<16x160xbf16>
    %c0_1 = arith.constant 0 : index
    %c0_2 = arith.constant 0 : index
    %1 = vector.load %arg1[%c0_1, %c0_2] : memref<16x160xbf16, #tpu.memory_space<vmem>>, vector<16x160xbf16>
    %cst = arith.constant dense<0.000000e+00> : vector<16x16xf32>
    %2 = tpu.matmul %0, %1, %cst {dimension_numbers = #tpu.dot_dimension_numbers<[1], [1], [0], [0], [0, 0, 1, 0], [], []>} : vector<16x160xbf16>, vector<16x160xbf16>, vector<16x16xf32> -> vector<16x16xf32>
    %c0_3 = arith.constant 0 : index
    %c0_4 = arith.constant 0 : index
    %3 = vector.load %arg3[%c0_3, %c0_4] : memref<16x1xf32, #tpu.memory_space<vmem>>, vector<16x1xf32>
    %4 = vector.broadcast %3 : vector<16x1xf32> to vector<16x16xf32>
    %5 = arith.addf %2, %4 : vector<16x16xf32>
    %c0_5 = arith.constant 0 : index
    %c0_6 = arith.constant 0 : index
    %6 = vector.load %arg4[%c0_5, %c0_6] : memref<16x16xf32, #tpu.memory_space<vmem>>, vector<16x16xf32>
    tpu.vector_store %arg4[%c0_5, %c0_6], %5 {strides = array<i32>} : memref<16x16xf32, #tpu.memory_space<vmem>>, vector<16x16xf32>,
    return
  }
  func.func @transform_0(%arg0: i32) -> (i32, i32) {
    %c0_i32 = arith.constant 0 : i32
    %c0_i32_0 = arith.constant 0 : i32
    return %arg0, %c0_i32 : i32, i32
  }
  func.func @transform_1(%arg0: i32) -> (i32, i32) {
    %c0_i32 = arith.constant 0 : i32
    %c0_i32_0 = arith.constant 0 : i32
    %c0_i32_1 = arith.constant 0 : i32
    return %c0_i32, %c0_i32_0 : i32, i32
  }
  func.func @transform_2(%arg0: i32) -> (i32, i32) {
    %c0_i32 = arith.constant 0 : i32
    %c0_i32_0 = arith.constant 0 : i32
    %c0_i32_1 = arith.constant 0 : i32
    return %c0_i32, %c0_i32_0 : i32, i32
  }
  func.func @transform_3(%arg0: i32) -> (i32, i32) {
    %c0_i32 = arith.constant 0 : i32
    %c0_i32_0 = arith.constant 0 : i32
    return %c0_i32, %arg0 : i32, i32
  }
}

</mosaic_0001>

<bundles_post_ra>
// kernel: tpu_custom_call.1
= control target key start
LH: loop header
LB: loop body
LE: loop exit
PB: predicated region body
PF: predicated region fallthrough
CT: control target
= control target key end

     0   :  { %8 = vsyncpa [#allocation3], 0  ;;  %s259_s0 = inlined_call_operand.vmem [shape: bf16[16,160], index: 0, kind: input, shape index: {}]   ;;  %s260_s1 = inlined_call_operand.hbm [shape: bf16[16,160], index: 1, kind: input, shape index: {}]   ;;  %s261_s2 = inlined_call_operand.vmem [shape: f32[16,1], index: 2, kind: input, shape index: {}]   ;;  %s262_s3 = inlined_call_operand.hbm [shape: f32[16,16], index: 3, kind: output, shape index: {}]  }
   0x1   :  { %9 = vsyncpa [#allocation4], 0  ;;  %s16_s14 = sshll.u32 %s260_s1, 4  ;;  %s202_s15 = smov [#allocation2]   ;;  %s17_s14 = int_to_ptr.hbm [resolvable:$true] %s16_s14 }
   0x2   :  { %s18_s16 = sshll.u32 %s202_s15, 4  ;;  %s203_s17 = smov 128   ;;  %s19_s16 = int_to_ptr.vmem [resolvable:$true] %s18_s16 }
   0x3   :  { %s204_s18 = smov 8  }
   0x4   :  { %24 = dma.hbm_to_vmem [thread:$0]  %s17_s14, 256, %s19_s16, [#allocation3], %s203_s17, %s203_s17, %s204_s18  }
   0x5   :  { %198 = dma.done.wait [#allocation3], 256  }
   0x6   :  { %199 = vsyncadd [#allocation3], 4294967040  ;;  %v205_v0 = vmov 0   ;;  %v133_v1 = vld [vmem:[%s259_s0] sm:$0xf]  ;;  %vm66_vm0 = vcmask 261120  }
   0x7   :  { %149 = vset.pattern.permute.xlu0 %v205_v0  ;;  %v143_v2 = vld [vmem:[%s259_s0 + $0x4] sm:$0xf0]  ;;  %v142_v3 = vld [vmem:[%s259_s0 + $0x4] sm:$0xf]  ;;  %v135_v5 = vld [vmem:[%s259_s0 + $0x8] sm:$0xf0] }
   0x8   :  { %v134_v4 = vor.u32 %v143_v2, %v133_v1  ;;  %v138_v6 = vor.u32 %v142_v3, %v135_v5  ;;  %v36_v7 = vld [vmem:[%s261_s2] sm:$0xff]  ;;  %v141_v9 = vld [vmem:[#allocation2 + $0x4] sm:$0xf0]  ;;  %v127_v12 = vld [vmem:[#allocation2 + $0x8] sm:$0xf0]  ;;  %vm101_vm1 = vcmask 130048  }
   0x9   :  { %v125_v8 = vld [vmem:[#allocation2] sm:$0xf]  ;;  %40 = vperm.xlu0 %149, %v36_v7   ;;  %v140_v11 = vld [vmem:[#allocation2 + $0x4] sm:$0xf]  ;;  %v37_v15 = vld [vmem:[%s261_s2 + $0x8] sm:$0xff]  ;;  %s206_s0 = smov [#allocation5]  }
   0xa   :  { %80 = vmatpush.bf16.xpose.msra.mxu0 %v134_v4  ;;  %v71_v10 = vsel %vm66_vm0, %v138_v6, 0  ;;  %v126_v13 = vor.u32 %v141_v9, %v125_v8  ;;  %v130_v14 = vor.u32 %v140_v11, %v127_v12  ;;  %s108_s30 = sshll.u32 %s206_s0, 4  ;;  %s110_s6 = sshll.u32 %s262_s3, 4  ;;  %s109_s30 = int_to_ptr.vmem [resolvable:$true] %s108_s30  ;;  %s111_s6 = int_to_ptr.hbm [resolvable:$true] %s110_s6 }
   0xb   :  { %94 = vmatpush.bf16.xpose.msra.mxu1 %v71_v10 }
  0x11   :  { %81 = vmatmul.bf16.vlgmr.msra.gmra.mxu0 %v126_v13  ;;  %45 = vperm.xlu0 %149, %v37_v15  }
  0x12   :  { %139 = vmatmul.msk.bf16.vlgmr.msra.gmra.mxu1 %vm66_vm0, %v130_v14 }
  0x7b   :  { %v41_v16 = vpop.permute.xlu0 %40 }
  0x83   :  { %v46_v21 = vpop.permute.xlu0 %45 }
  0x8e   :  { %v82_v17 = vpop.f32.mrf.mxu0 }
  0x8f   :  { %v83_v18 = vadd.f32 %v82_v17, %v41_v16  ;;  %v96_v19 = vpop.f32.mrf.mxu1 }
  0x91   :  { %v97_v20 = vadd.f32 %v96_v19, %v83_v18 }
  0x93   :  { %102 = vst.msk [vmem:[#allocation5] sm:$0xff] %vm101_vm1, %v97_v20 }
  0x96   :  { %v84_v22 = vpop.f32.mrf.mxu0 }
  0x97   :  { %v85_v23 = vadd.f32 %v84_v22, %v46_v21  ;;  %v98_v24 = vpop.f32.mrf.mxu1 }
  0x99   :  { %v99_v25 = vadd.f32 %v98_v24, %v85_v23 }
  0x9b   :  { %103 = vst.msk [vmem:[#allocation5 + $0x8] sm:$0xff] %vm101_vm1, %v99_v25 }
  0x9c   :  { %116 = dma.vmem_to_hbm [thread:$0]  %s109_s30, 256, %s111_s6, [#allocation4], %s203_s17, %s203_s17, %s204_s18  }
  0x9d   :  { %200 = dma.done.wait [#allocation4], 256  }
  0x9e   :  { %201 = vsyncadd [#allocation4], 4294967040 }
  0x9f   :  { %121 = vsyncpa [#allocation3], 1 }
  0xa0   :  { %122 = vsyncpa [#allocation4], 1 }

</bundles_post_ra>
